<compile_context>
chip_gen: v7x
topology: tpu7x:2x2x1
jax: 0.10.0
libtpu: 0.0.40
codegen_flags: <defaults>
</compile_context>

<pallas_src>
import jax
import jax.numpy as jnp
from jax import lax
from jax.experimental import pallas as pl
from jax.experimental.pallas import tpu as pltpu


def _round_up(x, m):
    return ((x + m - 1) // m) * m


def policy_net_kernel(x_ref, w1_ref, b1_ref, w2_ref, b2_ref, outT_ref):
    # x_ref: (tb, state) batch-major tile straight from HBM (no wrapper
    # transpose/pad).  Contract the feature axes of w1 (out,in) and x so the
    # result is feature-major (hidden, tb): batch rides the 128-wide lane
    # axis and the fc2 / softmax / store path stays lane-dense.
    h = lax.dot_general(
        w1_ref[...], x_ref[...],
        dimension_numbers=(((1,), (1,)), ((), ())),
        preferred_element_type=jnp.float32,
    )                                                     # (hidden, tb) f32
    h = jnp.maximum(h + b1_ref[...], 0.0)                 # bias + ReLU in f32

    # fc2: (action, hidden) @ (hidden, tb) -> (action, tb), f32 accumulate.
    logits = jnp.dot(
        w2_ref[...], h.astype(w2_ref.dtype),
        preferred_element_type=jnp.float32,
    ) + b2_ref[...]

    action_dim = logits.shape[0]           # static -> trace-time branch
    if action_dim == 2:
        # Binary softmax == sigmoid of the logit difference: removes the two
        # cross-sublane reductions (max/sum) and one exp per lane column.
        d = logits[1:2, :] - logits[0:1, :]                # (1, tb)
        p0 = pl.reciprocal(1.0 + jnp.exp(d))               # stable, exact
        outT_ref[0:1, :] = p0.astype(outT_ref.dtype)
        outT_ref[1:2, :] = (1.0 - p0).astype(outT_ref.dtype)
    else:
        # General numerically-stable softmax over the action (sublane) axis.
        m = jnp.max(logits, axis=0, keepdims=True)
        e = jnp.exp(logits - m)
        denom = jnp.sum(e, axis=0, keepdims=True)
        outT_ref[...] = (e * pl.reciprocal(denom)).astype(outT_ref.dtype)


def policy_net_forward(x, w1, b1, w2, b2, *, tb=None, max_tb=8192,
                       use_bf16=False, action_major=False):
    """Forward pass of PolicyNet.

    x : (batch, state_dim) f32
    w1: (hidden_dim, state_dim)   b1: (hidden_dim,)     (PyTorch Linear layout)
    w2: (action_dim, hidden_dim)  b2: (action_dim,)
    Returns (batch, action_dim) action probabilities
    (or (action_dim, batch) lane-dense if action_major=True).
    """
    batch, state_dim = x.shape
    hidden_dim = w1.shape[0]
    action_dim = w2.shape[0]

    # --- batch-tile selection -------------------------------------------
    # Big tiles amortize the ~0.35 us/step grid + DMA-setup overhead; keep
    # >=2 tiles when the batch allows so v7x's two TensorCores both work.
    if tb is None:
        if batch <= 128:
            tb = 128
        else:
            tb = min(max_tb, _round_up(pl.cdiv(batch, 2), 128))
    num_tiles = pl.cdiv(batch, tb)

    act_dtype = jnp.bfloat16 if use_bf16 else jnp.float32
    x_in = x.astype(act_dtype)
    w1_in = w1.astype(act_dtype)
    w2_in = w2.astype(act_dtype)
    b1c = b1.reshape(hidden_dim, 1).astype(jnp.float32)
    b2c = b2.reshape(action_dim, 1).astype(jnp.float32)

    # --- VMEM budget (per grid step): fc1 intermediate dominates ---------
    esize = jnp.dtype(act_dtype).itemsize
    vmem_need = (
        tb * (4 * hidden_dim                  # h = (hidden, tb) f32
              + 2 * esize * state_dim         # double-buffered x stream
              + 2 * 4 * action_dim            # double-buffered out stream
              + 4 * action_dim)               # logits/probs temporaries
        + esize * (hidden_dim * state_dim + action_dim * hidden_dim)
        + 4 * (hidden_dim + action_dim)
    )
    vmem_limit = int(2 * vmem_need) if vmem_need > 12 * 2**20 else None

    # --- advisory cost estimate ------------------------------------------
    work = num_tiles * tb
    flops = 2 * work * (state_dim * hidden_dim + hidden_dim * action_dim)
    bytes_accessed = (
        esize * batch * state_dim + 4 * batch * action_dim
        + esize * (hidden_dim * state_dim + action_dim * hidden_dim)
        + 4 * (hidden_dim + action_dim)
    )
    cost = pl.CostEstimate(
        flops=flops,
        transcendentals=work * max(action_dim - 1, 1),
        bytes_accessed=bytes_accessed,
    )

    probsT = pl.pallas_call(
        policy_net_kernel,
        out_shape=jax.ShapeDtypeStruct((action_dim, batch), jnp.float32),
        grid=(num_tiles,),
        in_specs=[
            # Activation stream: batch-major tiles, batch axis tiled by tb.
            pl.BlockSpec((tb, state_dim), lambda i: (i, 0)),
            # Weights / biases: resident blocks (same block index every step).
            pl.BlockSpec((hidden_dim, state_dim), lambda i: (0, 0)),
            pl.BlockSpec((hidden_dim, 1), lambda i: (0, 0)),
            pl.BlockSpec((action_dim, hidden_dim), lambda i: (0, 0)),
            pl.BlockSpec((action_dim, 1), lambda i: (0, 0)),
        ],
        out_specs=pl.BlockSpec((action_dim, tb), lambda i: (0, i)),
        compiler_params=pltpu.CompilerParams(
            dimension_semantics=("parallel",),
            vmem_limit_bytes=vmem_limit,
        ),
        cost_estimate=cost,
    )(x_in, w1_in, b1c, w2_in, b2c)

    if action_major:
        return probsT            # (action_dim, batch), lane-dense
    return probsT.T              # (batch, action_dim) — matches the module


def init_params(key, state_dim, hidden_dim, action_dim):
    # PyTorch-Linear-like uniform fan-in init, weights stored (out, in).
    k1, k2, k3, k4 = jax.random.split(key, 4)
    bound1 = 1.0 / jnp.sqrt(state_dim)
    bound2 = 1.0 / jnp.sqrt(hidden_dim)
    w1 = jax.random.uniform(k1, (hidden_dim, state_dim), jnp.float32, -bound1, bound1)
    b1 = jax.random.uniform(k2, (hidden_dim,), jnp.float32, -bound1, bound1)
    w2 = jax.random.uniform(k3, (action_dim, hidden_dim), jnp.float32, -bound2, bound2)
    b2 = jax.random.uniform(k4, (action_dim,), jnp.float32, -bound2, bound2)
    return w1, b1, w2, b2


if __name__ == "__main__":
    # CartPole-v0: state_dim=4, action_dim=2; hidden_dim=128 per the module.
    state_dim, hidden_dim, action_dim = 4, 128, 2

    key = jax.random.PRNGKey(0)
    kx, kx2, kp = jax.random.split(key, 3)
    w1, b1, w2, b2 = init_params(kp, state_dim, hidden_dim, action_dim)

    def reference(xr):
        h = jnp.maximum(xr @ w1.T + b1, 0.0)
        return jax.nn.softmax(h @ w2.T + b2, axis=1)

    # Small CartPole-style batch (the module's literal use case).
    x = jax.random.normal(kx, (2, state_dim), jnp.float32)
    out = jax.block_until_ready(policy_net_forward(x, w1, b1, w2, b2))
    assert out.shape == (2, action_dim)
    assert jnp.allclose(out, reference(x), atol=1e-4, rtol=1e-4)
    assert jnp.allclose(jnp.sum(out, axis=1), 1.0, atol=1e-5)

    # Larger ragged batch: exercises the adaptive tile (>=2 tiles for v7x
    # megacore) and the Pallas-handled partial last tile (no wrapper pad).
    x2 = jax.random.normal(kx2, (300, state_dim), jnp.float32)
    out2 = jax.block_until_ready(policy_net_forward(x2, w1, b1, w2, b2))
    assert out2.shape == (300, action_dim)
    assert jnp.allclose(out2, reference(x2), atol=1e-4, rtol=1e-4)
    assert jnp.allclose(jnp.sum(out2, axis=1), 1.0, atol=1e-5)

    print("KERNEL_OK")
</pallas_src>

<mosaic_0001>
module attributes {stable_mosaic.version = 11 : i64} {
  func.func @policy_net_kernel(%arg0: i32, %arg1: memref<128x4xf32, #tpu.memory_space<vmem>>, %arg2: memref<128x4xf32, #tpu.memory_space<vmem>>, %arg3: memref<128x1xf32, #tpu.memory_space<vmem>>, %arg4: memref<2x128xf32, #tpu.memory_space<vmem>>, %arg5: memref<2x1xf32, #tpu.memory_space<vmem>>, %arg6: memref<2x128xf32, #tpu.memory_space<vmem>>) attributes {dimension_semantics = [#tpu.dimension_semantics<parallel>], iteration_bounds = array<i64: 1>, scalar_prefetch = 0 : i64, scratch_operands = 0 : i64, tpu.core_type = #tpu.core_type<tc>, window_params = [{transform_indices = @transform_0, window_bounds = array<i64: 128, 4>}, {pipeline_mode = #tpu.pipeline_mode<synchronous>, transform_indices = @transform_1, window_bounds = array<i64: 128, 4>}, {pipeline_mode = #tpu.pipeline_mode<synchronous>, transform_indices = @transform_2, window_bounds = array<i64: 128, 1>}, {pipeline_mode = #tpu.pipeline_mode<synchronous>, transform_indices = @transform_3, window_bounds = array<i64: 2, 128>}, {pipeline_mode = #tpu.pipeline_mode<synchronous>, transform_indices = @transform_4, window_bounds = array<i64: 2, 1>}, {transform_indices = @transform_5, window_bounds = array<i64: 2, 128>}]} {
    %c0 = arith.constant 0 : index
    %c0_0 = arith.constant 0 : index
    %0 = vector.load %arg2[%c0, %c0_0] : memref<128x4xf32, #tpu.memory_space<vmem>>, vector<128x4xf32>
    %c0_1 = arith.constant 0 : index
    %c0_2 = arith.constant 0 : index
    %1 = vector.load %arg1[%c0_1, %c0_2] : memref<128x4xf32, #tpu.memory_space<vmem>>, vector<128x4xf32>
    %cst = arith.constant dense<0.000000e+00> : vector<128x128xf32>
    %2 = tpu.matmul %0, %1, %cst {dimension_numbers = #tpu.dot_dimension_numbers<[1], [1], [0], [0], [0, 0, 1, 0], [], []>} : vector<128x4xf32>, vector<128x4xf32>, vector<128x128xf32> -> vector<128x128xf32>
    %c0_3 = arith.constant 0 : index
    %c0_4 = arith.constant 0 : index
    %3 = vector.load %arg3[%c0_3, %c0_4] : memref<128x1xf32, #tpu.memory_space<vmem>>, vector<128x1xf32>
    %4 = vector.broadcast %3 : vector<128x1xf32> to vector<128x128xf32>
    %5 = arith.addf %2, %4 : vector<128x128xf32>
    %cst_5 = arith.constant 0.000000e+00 : f32
    %6 = vector.broadcast %cst_5 : f32 to vector<128x128xf32>
    %7 = arith.maximumf %5, %6 : vector<128x128xf32>
    %c0_6 = arith.constant 0 : index
    %c0_7 = arith.constant 0 : index
    %8 = vector.load %arg4[%c0_6, %c0_7] : memref<2x128xf32, #tpu.memory_space<vmem>>, vector<2x128xf32>
    %cst_8 = arith.constant dense<0.000000e+00> : vector<2x128xf32>
    %9 = tpu.matmul %8, %7, %cst_8 {dimension_numbers = #tpu.dot_dimension_numbers<[1], [0], [0], [1], [0, 0, 1, 1], [], []>} : vector<2x128xf32>, vector<128x128xf32>, vector<2x128xf32> -> vector<2x128xf32>
    %c0_9 = arith.constant 0 : index
    %c0_10 = arith.constant 0 : index
    %10 = vector.load %arg5[%c0_9, %c0_10] : memref<2x1xf32, #tpu.memory_space<vmem>>, vector<2x1xf32>
    %11 = vector.broadcast %10 : vector<2x1xf32> to vector<2x128xf32>
    %12 = arith.addf %9, %11 : vector<2x128xf32>
    %13 = vector.extract_strided_slice %12 {offsets = [1, 0], sizes = [1, 128], strides = [1, 1]} : vector<2x128xf32> to vector<1x128xf32>
    %14 = vector.extract_strided_slice %12 {offsets = [0, 0], sizes = [1, 128], strides = [1, 1]} : vector<2x128xf32> to vector<1x128xf32>
    %15 = arith.subf %13, %14 : vector<1x128xf32>
    %16 = math.exp %15 : vector<1x128xf32>
    %cst_11 = arith.constant 1.000000e+00 : f32
    %17 = vector.broadcast %cst_11 : f32 to vector<1x128xf32>
    %18 = arith.addf %17, %16 : vector<1x128xf32>
    %19 = tpu.reciprocal %18 : vector<1x128xf32> -> vector<1x128xf32>
    %c0_12 = arith.constant 0 : index
    %c0_13 = arith.constant 0 : index
    %20 = vector.load %arg6[%c0_12, %c0_13] : memref<2x128xf32, #tpu.memory_space<vmem>>, vector<1x128xf32>
    tpu.vector_store %arg6[%c0_12, %c0_13], %19 {strides = array<i32>} : memref<2x128xf32, #tpu.memory_space<vmem>>, vector<1x128xf32>,
    %cst_14 = arith.constant 1.000000e+00 : f32
    %21 = vector.broadcast %cst_14 : f32 to vector<1x128xf32>
    %22 = arith.subf %21, %19 : vector<1x128xf32>
    %c1 = arith.constant 1 : index
    %c0_15 = arith.constant 0 : index
    %23 = vector.load %arg6[%c1, %c0_15] : memref<2x128xf32, #tpu.memory_space<vmem>>, vector<1x128xf32>
    tpu.vector_store %arg6[%c1, %c0_15], %22 {strides = array<i32>} : memref<2x128xf32, #tpu.memory_space<vmem>>, vector<1x128xf32>,
    return
  }
  func.func @transform_0(%arg0: i32) -> (i32, i32) {
    %c0_i32 = arith.constant 0 : i32
    %c0_i32_0 = arith.constant 0 : i32
    return %arg0, %c0_i32 : i32, i32
  }
  func.func @transform_1(%arg0: i32) -> (i32, i32) {
    %c0_i32 = arith.constant 0 : i32
    %c0_i32_0 = arith.constant 0 : i32
    %c0_i32_1 = arith.constant 0 : i32
    return %c0_i32, %c0_i32_0 : i32, i32
  }
  func.func @transform_2(%arg0: i32) -> (i32, i32) {
    %c0_i32 = arith.constant 0 : i32
    %c0_i32_0 = arith.constant 0 : i32
    %c0_i32_1 = arith.constant 0 : i32
    return %c0_i32, %c0_i32_0 : i32, i32
  }
  func.func @transform_3(%arg0: i32) -> (i32, i32) {
    %c0_i32 = arith.constant 0 : i32
    %c0_i32_0 = arith.constant 0 : i32
    %c0_i32_1 = arith.constant 0 : i32
    return %c0_i32, %c0_i32_0 : i32, i32
  }
  func.func @transform_4(%arg0: i32) -> (i32, i32) {
    %c0_i32 = arith.constant 0 : i32
    %c0_i32_0 = arith.constant 0 : i32
    %c0_i32_1 = arith.constant 0 : i32
    return %c0_i32, %c0_i32_0 : i32, i32
  }
  func.func @transform_5(%arg0: i32) -> (i32, i32) {
    %c0_i32 = arith.constant 0 : i32
    %c0_i32_0 = arith.constant 0 : i32
    return %c0_i32, %arg0 : i32, i32
  }
}

</mosaic_0001>

<bundles_post_ra>
// kernel: tpu_custom_call.1
= control target key start
LH: loop header
LB: loop body
LE: loop exit
PB: predicated region body
PF: predicated region fallthrough
CT: control target
= control target key end

     0   :  { %vm149_vm0 = vcmask 31744   ;;  %v788_v6 = vmov 0   ;;  %s1047_s0 = inlined_call_operand.vmem [shape: f32[2,4], index: 0, kind: input, shape index: {}]   ;;  %s1048_s1 = inlined_call_operand.vmem [shape: f32[128,4], index: 1, kind: input, shape index: {}]   ;;  %s1049_s2 = inlined_call_operand.vmem [shape: f32[128,1], index: 2, kind: input, shape index: {}]   ;;  %s1050_s3 = inlined_call_operand.vmem [shape: f32[2,128], index: 3, kind: input, shape index: {}]   ;;  %s1051_s4 = inlined_call_operand.vmem [shape: f32[2,1], index: 4, kind: input, shape index: {}]   ;;  %s1052_s5 = inlined_call_operand.hbm [shape: f32[2,2], index: 5, kind: output, shape index: {}]  }
   0x1   :  { %v37_v0 = vld [vmem:[%s1047_s0] sm:$0xff]  ;;  %v38_v1 = vld [vmem:[%s1047_s0 + $0x8] sm:$0xff]  ;;  %v39_v2 = vld [vmem:[%s1047_s0 + $0x10] sm:$0xff]  ;;  %758 = vset.pattern.permute.xlu0 %v788_v6  ;;  %759 = vset.pattern.permute.xlu1 %v788_v6 }
   0x2   :  { %v681_v3 = vpack.c.bf16 %v38_v1, %v37_v0  ;;  %vm834_vm1 = vmpackc.low %vm149_vm0, %vm149_vm0  ;;  %v40_v5 = vld [vmem:[%s1047_s0 + $0x18] sm:$0xff]  ;;  %v21_v8 = vld [vmem:[%s1048_s1] sm:$0xff] }
   0x3   :  { %v687_v7 = vpack.c.bf16 %v40_v5, %v39_v2  ;;  %v41_v9 = vld [vmem:[%s1047_s0 + $0x20] sm:$0xff]  ;;  %v42_v10 = vld [vmem:[%s1047_s0 + $0x28] sm:$0xff]  ;;  %622 = vmatprep.mubr.msk.f32.mxu0 %vm149_vm0, %v21_v8  ;;  %v55_v13 = vld [vmem:[%s1049_s2 + $0x10] sm:$0xff] }
   0x4   :  { %683 = vmatprep.subr.msk.bf16.mxu0 %vm834_vm1, %v681_v3  ;;  %v693_v11 = vpack.c.bf16 %v42_v10, %v41_v9  ;;  %v53_v12 = vld [vmem:[%s1049_s2] sm:$0xff]  ;;  %v54_v14 = vld [vmem:[%s1049_s2 + $0x8] sm:$0xff]  ;;  %81 = vperm.xlu1 %759, %v55_v13   ;;  %v43_v15 = vld [vmem:[%s1047_s0 + $0x30] sm:$0xff] }
   0x5   :  { %686 = vmatpush3.bf16.xpose.msk.msra.mxu0 %vm834_vm1, %v681_v3  ;;  %71 = vperm.xlu0 %758, %v53_v12   ;;  %v44_v16 = vld [vmem:[%s1047_s0 + $0x38] sm:$0xff] }
   0x6   :  { %689 = vmatprep.subr.msk.bf16.mxu0 %vm834_vm1, %v687_v7  ;;  %v56_v17 = vld [vmem:[%s1049_s2 + $0x18] sm:$0xff] }
   0x9   :  { %76 = vperm.xlu0 %758, %v54_v14  }
   0xd   :  { %692 = vmatpush3.bf16.xpose.msk.msra.mxu0 %vm834_vm1, %v687_v7 }
   0xe   :  { %695 = vmatprep.subr.msk.bf16.mxu0 %vm834_vm1, %v693_v11 }
   0xf   :  { %10 = vsyncpa [#allocation3], 0  ;;  %v699_v18 = vpack.c.bf16 %v44_v16, %v43_v15  ;;  %v57_v19 = vld [vmem:[%s1049_s2 + $0x20] sm:$0xff]  ;;  %86 = vperm.xlu1 %759, %v56_v17   ;;  %v58_v20 = vld [vmem:[%s1049_s2 + $0x28] sm:$0xff]  ;;  %v789_v59 = vmov 0.0|0.0   ;;  %vm790_vm2 = vmmov 0  }
  0x10   :  { %91 = vperm.xlu0 %758, %v57_v19   ;;  %v59_v21 = vld [vmem:[%s1049_s2 + $0x30] sm:$0xff]  ;;  %v45_v22 = vld [vmem:[%s1047_s0 + $0x40] sm:$0xff]  ;;  %v46_v23 = vld [vmem:[%s1047_s0 + $0x48] sm:$0xff]  ;;  %729 = vmatprep.subr.bf16.mxu1 %v789_v59  ;;  %v791_v60 = vmov 0.0   ;;  %s792_s12 = smov [#allocation2]  }
  0x11   :  { %v60_v24 = vld [vmem:[%s1049_s2 + $0x38] sm:$0xff]  ;;  %v705_v25 = vpack.c.bf16 %v46_v23, %v45_v22  ;;  %v61_v26 = vld [vmem:[%s1049_s2 + $0x40] sm:$0xff]  ;;  %v62_v27 = vld [vmem:[%s1049_s2 + $0x48] sm:$0xff]  ;;  %678 = vmatprep.mubr.msk.f32.mxu1 %vm790_vm2, %v791_v60 }
  0x12   :  { %v63_v28 = vld [vmem:[%s1049_s2 + $0x50] sm:$0xff]  ;;  %v48_v30 = vld [vmem:[%s1047_s0 + $0x58] sm:$0xff]  ;;  %v65_v33 = vld [vmem:[%s1049_s2 + $0x60] sm:$0xff] }
  0x13   :  { %96 = vperm.xlu1 %759, %v58_v20   ;;  %v47_v29 = vld [vmem:[%s1047_s0 + $0x50] sm:$0xff]  ;;  %v64_v31 = vld [vmem:[%s1049_s2 + $0x58] sm:$0xff]  ;;  %v66_v34 = vld [vmem:[%s1049_s2 + $0x68] sm:$0xff] }
  0x14   :  { %101 = vperm.xlu0 %758, %v59_v21   ;;  %v711_v32 = vpack.c.bf16 %v48_v30, %v47_v29  ;;  %v67_v35 = vld [vmem:[%s1049_s2 + $0x70] sm:$0xff]  ;;  %v49_v36 = vld [vmem:[%s1047_s0 + $0x60] sm:$0xff]  ;;  %v50_v37 = vld [vmem:[%s1047_s0 + $0x68] sm:$0xff] }
  0x15   :  { %698 = vmatpush3.bf16.xpose.msk.msra.mxu0 %vm834_vm1, %v693_v11  ;;  %v68_v38 = vld [vmem:[%s1049_s2 + $0x78] sm:$0xff]  ;;  %v717_v39 = vpack.c.bf16 %v50_v37, %v49_v36  ;;  %v408_v40 = vld [vmem:[%s1051_s4] sm:$0x3]  ;;  %v51_v41 = vld [vmem:[%s1047_s0 + $0x70] sm:$0xff] }
  0x16   :  { %701 = vmatprep.subr.msk.bf16.mxu0 %vm834_vm1, %v699_v18  ;;  %v52_v42 = vld [vmem:[%s1047_s0 + $0x78] sm:$0xff]  ;;  %v22_v44 = vld [vmem:[%s1048_s1 + $0x8] sm:$0xff]  ;;  %v23_v45 = vld [vmem:[%s1048_s1 + $0x10] sm:$0xff]  ;;  %s501_s0 = sshll.u32 %s792_s12, 4  ;;  %s502_s0 = int_to_ptr.vmem [resolvable:$true] %s501_s0 }
  0x17   :  { %106 = vperm.xlu1 %759, %v60_v24   ;;  %v723_v43 = vpack.c.bf16 %v52_v42, %v51_v41  ;;  %v24_v46 = vld [vmem:[%s1048_s1 + $0x18] sm:$0xff]  ;;  %v25_v47 = vld [vmem:[%s1048_s1 + $0x20] sm:$0xff]  ;;  %v26_v48 = vld [vmem:[%s1048_s1 + $0x28] sm:$0xff]  ;;  %p769_p1 = scmp.lt.s32.totalorder %s502_s0, %s502_s0 }
  0x18   :  { %111 = vperm.xlu0 %758, %v61_v26   ;;  %v27_v49 = vld [vmem:[%s1048_s1 + $0x30] sm:$0xff]  ;;  %v28_v50 = vld [vmem:[%s1048_s1 + $0x38] sm:$0xff]  ;;  %v29_v51 = vld [vmem:[%s1048_s1 + $0x40] sm:$0xff] }
  0x19   :  { %v30_v52 = vld [vmem:[%s1048_s1 + $0x48] sm:$0xff]  ;;  %v31_v53 = vld [vmem:[%s1048_s1 + $0x50] sm:$0xff]  ;;  %v32_v54 = vld [vmem:[%s1048_s1 + $0x58] sm:$0xff] }
  0x1a   :  { %v33_v55 = vld [vmem:[%s1048_s1 + $0x60] sm:$0xff]  ;;  %v34_v56 = vld [vmem:[%s1048_s1 + $0x68] sm:$0xff]  ;;  %v35_v57 = vld [vmem:[%s1048_s1 + $0x70] sm:$0xff] }
  0x1b   :  { %116 = vperm.xlu1 %759, %v62_v27   ;;  %v36_v58 = vld [vmem:[%s1048_s1 + $0x78] sm:$0xff] }
  0x1c   :  { %121 = vperm.xlu0 %758, %v63_v28  }
  0x1d   :  { %704 = vmatpush3.bf16.xpose.msk.msra.mxu0 %vm834_vm1, %v699_v18 }
  0x1e   :  { %707 = vmatprep.subr.msk.bf16.mxu0 %vm834_vm1, %v705_v25 }
  0x1f   :  { %126 = vperm.xlu1 %759, %v64_v31  }
  0x20   :  { %131 = vperm.xlu0 %758, %v65_v33  }
  0x23   :  { %136 = vperm.xlu1 %759, %v66_v34  }
  0x24   :  { %141 = vperm.xlu0 %758, %v67_v35  }
  0x25   :  { %710 = vmatpush3.bf16.xpose.msk.msra.mxu0 %vm834_vm1, %v705_v25 }
  0x26   :  { %713 = vmatprep.subr.msk.bf16.mxu0 %vm834_vm1, %v711_v32 }
  0x27   :  { %146 = vperm.xlu1 %759, %v68_v38  }
  0x28   :  { %411 = vperm.xlu0 %758, %v408_v40  }
  0x2d   :  { %716 = vmatpush3.bf16.xpose.msk.msra.mxu0 %vm834_vm1, %v711_v32 }
  0x2e   :  { %719 = vmatprep.subr.msk.bf16.mxu0 %vm834_vm1, %v717_v39 }
  0x35   :  { %722 = vmatpush3.bf16.xpose.msk.msra.mxu0 %vm834_vm1, %v717_v39 }
  0x36   :  { %725 = vmatprep.subr.msk.bf16.mxu0 %vm834_vm1, %v723_v43 }
  0x3d   :  { %728 = vmatpush3.bf16.xpose.msk.msra.mxu0 %vm834_vm1, %v723_v43 }
  0x44   :  { %623 = vmatmul.mubr.msk.f32.vlgmr.msra.gmra.mrb[0].mxu0 %vm149_vm0, %v22_v44 }
  0x45   :  { %625 = vmatprep.mubr.msk.f32.mxu0 %vm149_vm0, %v23_v45 }
  0x48   :  { %626 = vmatmul.mubr.msk.f32.gmra.mrb[2].mxu0 %vm149_vm0, %v24_v46 }
  0x49   :  { %628 = vmatprep.mubr.msk.f32.mxu0 %vm149_vm0, %v25_v47 }
  0x4c   :  { %629 = vmatmul.mubr.msk.f32.gmra.mrb[4].mxu0 %vm149_vm0, %v26_v48 }
  0x4d   :  { %631 = vmatprep.mubr.msk.f32.mxu0 %vm149_vm0, %v27_v49 }
  0x50   :  { %632 = vmatmul.mubr.msk.f32.gmra.mrb[6].mxu0 %vm149_vm0, %v28_v50 }
  0x51   :  { %634 = vmatprep.mubr.msk.f32.mxu0 %vm149_vm0, %v29_v51 }
  0x54   :  { %635 = vmatmul.mubr.msk.f32.gmra.mrb[8].mxu0 %vm149_vm0, %v30_v52 }
  0x55   :  { %637 = vmatprep.mubr.msk.f32.mxu0 %vm149_vm0, %v31_v53 }
  0x58   :  { %638 = vmatmul.mubr.msk.f32.gmra.mrb[10].mxu0 %vm149_vm0, %v32_v54 }
  0x59   :  { %640 = vmatprep.mubr.msk.f32.mxu0 %vm149_vm0, %v33_v55 }
  0x5c   :  { %641 = vmatmul.mubr.msk.f32.gmra.mrb[12].mxu0 %vm149_vm0, %v34_v56 }
  0x5d   :  { %643 = vmatprep.mubr.msk.f32.mxu0 %vm149_vm0, %v35_v57 }
  0x60   :  { %644 = vmatmul.mubr.msk.f32.gmra.mrb[14].mxu0 %vm149_vm0, %v36_v58 }
  0x83   :  { %v82_v61 = vpop.permute.xlu1 %81 }
  0x84   :  { %v72_v62 = vpop.permute.xlu0 %71 }
  0x88   :  { %v77_v0 = vpop.permute.xlu0 %76 }
  0x8e   :  { %v87_v63 = vpop.permute.xlu1 %86 }
  0x8f   :  { %v92_v2 = vpop.permute.xlu0 %91 }
  0x92   :  { %v97_v1 = vpop.permute.xlu1 %96 }
  0x93   :  { %v102_v11 = vpop.permute.xlu0 %101 }
  0x96   :  { %v107_v8 = vpop.permute.xlu1 %106 }
  0x97   :  { %v112_v24 = vpop.permute.xlu0 %111 }
  0x9a   :  { %v117_v21 = vpop.permute.xlu1 %116 }
  0x9b   :  { %v122_v36 = vpop.permute.xlu0 %121 }
  0x9e   :  { %v127_v33 = vpop.permute.xlu1 %126 }
  0x9f   :  { %v132_v49 = vpop.permute.xlu0 %131 }
  0xa2   :  { %v137_v46 = vpop.permute.xlu1 %136 }
  0xa6   :  { %v147_v58 = vpop.permute.xlu1 %146 }
 0x117   :  { %v624_v3 = vpop.f32.mrb[0].mxu0 }
 0x118   :  { %v318_v4 = vadd.f32 %v624_v3, %v77_v0  ;;  %v312_v5 = vpop.f32.mrb[1].mxu0 }
 0x119   :  { %v313_v6 = vadd.f32 %v312_v5, %v72_v62  ;;  %v142_v62 = vpop.permute.xlu0 %141 }
 0x11a   :  { %v392_v7 = vmax.f32 %v318_v4, 0.0 }
 0x11b   :  { %v391_v9 = vmax.f32 %v313_v6, 0.0  ;;  %v627_v10 = vpop.f32.mrb[2].mxu0  ;;  %v407_v6 = vld [vmem:[%s1050_s3] sm:$0x3]  ;;  %s764_s3 = scalar_lea.vmem %s502_s0, 32 }
 0x11c   :  { %v328_v12 = vadd.f32 %v627_v10, %v87_v63  ;;  %v322_v13 = vpop.f32.mrb[3].mxu0  ;;  %p765_p0 = scmp.ne.s32.totalorder %s502_s0, %s764_s3  ;;  %p770_p2 = scmp.lt.s32.totalorder %s764_s3, %s764_s3 }
 0x11d   :  { %v323_v14 = vadd.f32 %v322_v13, %v82_v61  ;;  %v730_v15 = vpack.c.bf16 %v392_v7, %v391_v9  ;;  %v412_v7 = vpop.permute.xlu0 %411 }
 0x11e   :  { %v394_v16 = vmax.f32 %v328_v12, 0.0  ;;  %p771_p3 = por %p770_p2, %p769_p1 }
 0x11f   :  { %v393_v17 = vmax.f32 %v323_v14, 0.0  ;;  %v630_v18 = vpop.f32.mrb[4].mxu0  ;;  %731 = vmatpush3.bf16.msra.mxu1 %v730_v15 }
 0x120   :  { %v338_v19 = vadd.f32 %v630_v18, %v97_v1  ;;  %v332_v20 = vpop.f32.mrb[5].mxu0  ;;  %732 = vmatprep.subr.bf16.mxu1 %v789_v59  ;;  %p772_p4 = pnand %p771_p3, %p765_p0 }
 0x121   :  { %v733_v22 = vpack.c.bf16 %v394_v16, %v393_v17  ;;  %v333_v23 = vadd.f32 %v332_v20, %v92_v2 }
 0x122   :  { %v396_v25 = vmax.f32 %v338_v19, 0.0 }
 0x123   :  { %v395_v26 = vmax.f32 %v333_v23, 0.0  ;;  %v633_v27 = vpop.f32.mrb[6].mxu0  ;;  %734 = vmatpush3.bf16.msra.mxu1 %v733_v22 }
 0x124   :  { %v348_v28 = vadd.f32 %v633_v27, %v107_v8  ;;  %v342_v29 = vpop.f32.mrb[7].mxu0  ;;  %735 = vmatprep.subr.bf16.mxu1 %v789_v59 }
 0x125   :  { %v736_v30 = vpack.c.bf16 %v396_v25, %v395_v26  ;;  %v343_v31 = vadd.f32 %v342_v29, %v102_v11 }
 0x126   :  { %v398_v32 = vmax.f32 %v348_v28, 0.0 }
 0x127   :  { %v397_v34 = vmax.f32 %v343_v31, 0.0  ;;  %v636_v35 = vpop.f32.mrb[8].mxu0  ;;  %737 = vmatpush3.bf16.msra.mxu1 %v736_v30 }
 0x128   :  { %v358_v37 = vadd.f32 %v636_v35, %v117_v21  ;;  %v352_v38 = vpop.f32.mrb[9].mxu0  ;;  %738 = vmatprep.subr.bf16.mxu1 %v789_v59 }
 0x129   :  { %v739_v39 = vpack.c.bf16 %v398_v32, %v397_v34  ;;  %v353_v40 = vadd.f32 %v352_v38, %v112_v24 }
 0x12a   :  { %v400_v41 = vmax.f32 %v358_v37, 0.0 }
 0x12b   :  { %v399_v42 = vmax.f32 %v353_v40, 0.0  ;;  %v639_v43 = vpop.f32.mrb[10].mxu0  ;;  %740 = vmatpush3.bf16.msra.mxu1 %v739_v39 }
 0x12c   :  { %v368_v44 = vadd.f32 %v639_v43, %v127_v33  ;;  %v362_v45 = vpop.f32.mrb[11].mxu0  ;;  %741 = vmatprep.subr.bf16.mxu1 %v789_v59 }
 0x12d   :  { %v742_v47 = vpack.c.bf16 %v400_v41, %v399_v42  ;;  %v363_v48 = vadd.f32 %v362_v45, %v122_v36 }
 0x12e   :  { %v402_v50 = vmax.f32 %v368_v44, 0.0 }
 0x12f   :  { %v401_v51 = vmax.f32 %v363_v48, 0.0  ;;  %v642_v52 = vpop.f32.mrb[12].mxu0  ;;  %743 = vmatpush3.bf16.msra.mxu1 %v742_v47 }
 0x130   :  { %v378_v53 = vadd.f32 %v642_v52, %v137_v46  ;;  %v372_v54 = vpop.f32.mrb[13].mxu0  ;;  %744 = vmatprep.subr.bf16.mxu1 %v789_v59 }
 0x131   :  { %v745_v55 = vpack.c.bf16 %v402_v50, %v401_v51  ;;  %v373_v56 = vadd.f32 %v372_v54, %v132_v49 }
 0x132   :  { %v404_v57 = vmax.f32 %v378_v53, 0.0 }
 0x133   :  { %v403_v60 = vmax.f32 %v373_v56, 0.0  ;;  %v645_v61 = vpop.f32.mrb[14].mxu0  ;;  %746 = vmatpush3.bf16.msra.mxu1 %v745_v55 }
 0x134   :  { %v388_v63 = vadd.f32 %v645_v61, %v147_v58  ;;  %v382_v0 = vpop.f32.mrb[15].mxu0  ;;  %747 = vmatprep.subr.bf16.mxu1 %v789_v59 }
 0x135   :  { %v748_v1 = vpack.c.bf16 %v404_v57, %v403_v60  ;;  %v383_v2 = vadd.f32 %v382_v0, %v142_v62 }
 0x136   :  { %v406_v3 = vmax.f32 %v388_v63, 0.0 }
 0x137   :  { %v405_v4 = vmax.f32 %v383_v2, 0.0  ;;  %749 = vmatpush3.bf16.msra.mxu1 %v748_v1 }
 0x138   :  { %750 = vmatprep.subr.bf16.mxu1 %v789_v59 }
 0x139   :  { %v751_v5 = vpack.c.bf16 %v406_v3, %v405_v4 }
 0x13b   :  { %752 = vmatpush3.bf16.msra.mxu1 %v751_v5 }
 0x13e   :  { %679 = vmatmul.mubr.f32.vlgmr.msra.gmra.mrb[0].mxu1 %v407_v6 }
 0x211   :  { %v480_v8 = vpop.f32.mrb[0].mxu1 }
 0x212   :  { %v481_v9 = vadd.f32 %v480_v8, %v412_v7  ;;  %v680_v10 = vpop.f32.mrb[1].mxu1 }
 0x214   :  { %v485_v11 = vrot.slane %v481_v9, 7 }
 0x216   :  { %v487_v12 = vsub.f32 %v481_v9, %v485_v11 }
 0x218   :  { %v488_v13 = vmul.f32 1.442695, %v487_v12 }
 0x21a   :  { %760 = vpow2.f32 %v488_v13 }
 0x224   :  { %v761_v14 = vpop.eup %760 }
 0x225   :  { %v490_v15 = vadd.f32 1.0, %v761_v14 }
 0x227   :  { %762 = vrcp.f32 %v490_v15 }
 0x231   :  { %v763_v59 = vpop.eup %762 }
 0x232   :  { %492 = vst [vmem:[#allocation2 - $0x1] sm:$0x2] %v763_v59  ;;  %v493_v16 = vsub.f32 1.0, %v763_v59 }
 0x234   :  { %494 = vst [vmem:[#allocation2] sm:$0x2] %v493_v16 }
 0x235   :  { %775 = shalt.err (!%p772_p4)
}
 0x236   :  { %s776_s15 = scalar_lea.hbm %s1052_s5, 32 }
 0x237   :  { %p777_p5 = scmp.ne.s32.totalorder %s1052_s5, %s776_s15  ;;  %p780_p6 = scmp.lt.u32.totalorder %s776_s15, %s1052_s5 }
 0x239   :  { %p782_p7 = pnand %p780_p6, %p777_p5 }
 0x23b   :  { %785 = shalt.err (!%p782_p7)
}
 0x23c   :  { %504 = dma.vmem_to_hbm [thread:$0]  %s502_s0, 32, %s1052_s5, [#allocation3]  }
 0x23d   :  { %786 = dma.done.wait [#allocation3], 32  }
 0x23e   :  { %787 = vsyncadd [#allocation3], 4294967264 }
 0x23f   :  { %508 = vsyncpa [#allocation3], 1 }

</bundles_post_ra>
